<compile_context>
chip_gen: v7x
topology: tpu7x:2x2x1
jax: 0.10.0
libtpu: 0.0.40
codegen_flags: <defaults>
</compile_context>

<pallas_src>
import functools
import math

import jax
import jax.numpy as jnp
from jax import lax
from jax.experimental import pallas as pl
from jax.experimental.pallas import tpu as pltpu


def _round_up(x, m):
    return ((x + m - 1) // m) * m


def _lane_pad(n):
    return _round_up(max(n, 1), 128)


def _pick_tile(dim, preferred, align):
    """Largest multiple of `align` that divides `dim` and is <= preferred."""
    t = min(preferred, dim)
    t = max(align, (t // align) * align)
    while dim % t:
        t -= align
    return t


def _vmem_capacity_bytes():
    try:
        return int(pltpu.get_tpu_info().vmem_capacity_bytes)
    except Exception:
        return 64 << 20          # conservative fallback (v7x per-TC VMEM)


def _mos_kernel(*refs, has_bias):
    if has_bias:
        x_ref, w_ref, xa_ref, b_ref, bias_ref, o_ref, acc_ref = refs
    else:
        x_ref, w_ref, xa_ref, b_ref, o_ref, acc_ref = refs
        bias_ref = None

    k = pl.program_id(2)
    nk = pl.num_programs(2)
    dn = (((1,), (1,)), ((), ()))        # contract stored last dims: no .T

    @pl.when(k == 0)
    def _init():
        if bias_ref is not None:
            # Fold the bias into the accumulator init (one broadcast per
            # output tile instead of one broadcast+add per K step).
            acc_ref[...] = jnp.broadcast_to(
                bias_ref[...].astype(jnp.float32), acc_ref.shape)
        else:
            acc_ref[...] = jnp.zeros_like(acc_ref)

    # Dense branch: partial x @ W^T for this (i, j, k) tile.
    acc_ref[...] += lax.dot_general(x_ref[...], w_ref[...], dn,
                                    preferred_element_type=jnp.float32)

    @pl.when(k == nk - 1)
    def _finalize():
        # Low-rank branch: (x @ A^T) @ B^T with x @ A^T precomputed (xa).
        low_rank = lax.dot_general(
            xa_ref[...].astype(jnp.float32),
            b_ref[...].astype(jnp.float32),
            dn, preferred_element_type=jnp.float32)
        o_ref[...] = (acc_ref[...] + low_rank).astype(o_ref.dtype)


def mos_adapter_forward(x, weight, lora_a, lora_b, bias=None, *,
                        tile_b=None, tile_n=None, tile_k=None,
                        compute_dtype=None):
    """y = x @ weight^T + bias + x @ (lora_b @ lora_a)^T for 2-D or 3-D x."""
    orig_shape = x.shape
    if x.ndim == 3:
        x2d = x.reshape(-1, x.shape[-1])
    elif x.ndim == 2:
        x2d = x
    else:
        raise ValueError("Input x must be 2D or 3D")

    out_dtype = x.dtype
    batch, in_f = x2d.shape
    out_f = weight.shape[0]
    rank = lora_a.shape[0]
    assert weight.shape == (out_f, in_f)
    assert lora_a.shape == (rank, in_f) and lora_b.shape == (out_f, rank)
    assert in_f % 128 == 0 and out_f % 128 == 0, "features must be 128-aligned"

    # Optional bf16 compute path: halves the dominant W HBM stream and runs
    # the MXU at native bf16 rate; accumulation stays f32.
    if compute_dtype is not None:
        x2d = x2d.astype(compute_dtype)
        weight = weight.astype(compute_dtype)
        lora_a = lora_a.astype(compute_dtype)
        lora_b = lora_b.astype(compute_dtype)

    has_bias = bias is not None
    bias2d = bias.reshape(1, out_f) if has_bias else None

    # -------- Tile selection, derived from the actual VMEM capacity --------
    vmem_cap = _vmem_capacity_bytes()
    big_vmem = vmem_cap >= (100 << 20)           # v5e / v6e: 128 MiB
    if tile_b is None:
        tile_b = 512                             # fewer re-streams of W
    if tile_n is None:
        tile_n = 512 if big_vmem else 256
    if tile_k is None:
        tile_k = 1024 if big_vmem else 512

    tile_b = min(tile_b, _round_up(batch, 8))
    pad_b = _round_up(batch, tile_b)
    if pad_b != batch:                           # ragged batch: pad, slice back
        x2d = jnp.pad(x2d, ((0, pad_b - batch), (0, 0)))
    tile_n = _pick_tile(out_f, tile_n, 128)
    tile_k = _pick_tile(in_f, tile_k, 128)

    grid = (pad_b // tile_b, out_f // tile_n, in_f // tile_k)

    # Hoisted low-rank projection (tiny: batch x in x rank), kept in f32.
    xa = jnp.dot(x2d, lora_a.T, preferred_element_type=jnp.float32)

    # -------- VMEM budget (accounting for lane padding of rank dims) -------
    x_b = jnp.dtype(x2d.dtype).itemsize
    w_b = jnp.dtype(weight.dtype).itemsize
    lb_b = jnp.dtype(lora_b.dtype).itemsize
    o_b = jnp.dtype(out_dtype).itemsize
    est_bytes = (
        2 * tile_b * tile_k * x_b                 # x tile   (double buffered)
        + 2 * tile_n * tile_k * w_b               # W tile   (double buffered)
        + 2 * tile_b * _lane_pad(rank) * 4        # xa tile  (f32, lane-padded)
        + 2 * tile_n * _lane_pad(rank) * lb_b     # lora_B tile (lane-padded)
        + 2 * tile_b * tile_n * o_b               # output tile
        + tile_b * tile_n * 4)                    # f32 accumulator
    if has_bias:
        est_bytes += 2 * 8 * tile_n * jnp.dtype(bias2d.dtype).itemsize
    budget = int(vmem_cap * 0.85)
    vmem_limit = min(budget, max(16 << 20, int(est_bytes * 1.5)))

    # ----------------------------- pallas_call -----------------------------
    in_specs = [
        pl.BlockSpec((tile_b, tile_k), lambda i, j, k: (i, k)),   # x
        pl.BlockSpec((tile_n, tile_k), lambda i, j, k: (j, k)),   # W
        pl.BlockSpec((tile_b, rank), lambda i, j, k: (i, 0)),     # xa
        pl.BlockSpec((tile_n, rank), lambda i, j, k: (j, 0)),     # lora_B
    ]
    operands = [x2d, weight, xa, lora_b]
    if has_bias:
        in_specs.append(pl.BlockSpec((1, tile_n), lambda i, j, k: (0, j)))
        operands.append(bias2d)

    kernel = functools.partial(_mos_kernel, has_bias=has_bias)

    out = pl.pallas_call(
        kernel,
        out_shape=jax.ShapeDtypeStruct((pad_b, out_f), out_dtype),
        grid_spec=pltpu.PrefetchScalarGridSpec(
            num_scalar_prefetch=0,
            grid=grid,
            in_specs=in_specs,
            out_specs=pl.BlockSpec((tile_b, tile_n), lambda i, j, k: (i, j)),
            scratch_shapes=[pltpu.VMEM((tile_b, tile_n), jnp.float32)],
        ),
        compiler_params=pltpu.CompilerParams(
            dimension_semantics=("parallel", "parallel", "arbitrary"),
            vmem_limit_bytes=vmem_limit),
    )(*operands)

    out = out[:batch]
    if x.ndim == 3:
        out = out.reshape(orig_shape[0], orig_shape[1], out_f)
    return out


if __name__ == "__main__":
    key = jax.random.PRNGKey(0)
    batch, seq = 2, 8
    in_features, out_features = 128, 128
    rank_per_layer, shard_dim_ratio = 8, 2

    k_x, k_w, k_bias, k_a, k_b = jax.random.split(key, 5)

    # Frozen base linear layer (nn.Linear-style init bounds).
    bound = 1.0 / math.sqrt(in_features)
    weight = jax.random.uniform(k_w, (out_features, in_features),
                                minval=-bound, maxval=bound, dtype=jnp.float32)
    bias = jax.random.uniform(k_bias, (out_features,),
                              minval=-bound, maxval=bound, dtype=jnp.float32)

    # MoS shard pools: A shards concatenated along dim 0, B shards along dim 1
    # (mirrors _construct_lora_matrices).  The PyTorch module zero-inits B, so
    # we use small random B shards here purely to exercise the low-rank path.
    shard_rank = rank_per_layer // shard_dim_ratio
    a_keys = jax.random.split(k_a, shard_dim_ratio)
    b_keys = jax.random.split(k_b, shard_dim_ratio)
    a_shards = [jax.random.uniform(kk, (shard_rank, in_features),
                                   minval=-bound, maxval=bound,
                                   dtype=jnp.float32) for kk in a_keys]
    b_shards = [0.05 * jax.random.normal(kk, (out_features, shard_rank),
                                         dtype=jnp.float32) for kk in b_keys]
    lora_A = jnp.concatenate(a_shards, axis=0)      # (rank, in)
    lora_B = jnp.concatenate(b_shards, axis=1)      # (out, rank)

    x = jax.random.normal(k_x, (batch, seq, in_features), dtype=jnp.float32)

    y = mos_adapter_forward(x, weight, lora_A, lora_B, bias)
    y = jax.block_until_ready(y)

    # Pure-JAX reference of MoSAdapter.forward.
    delta_W = lora_B @ lora_A
    x2d = x.reshape(-1, in_features)
    y_ref = (x2d @ weight.T + bias[None, :] + x2d @ delta_W.T).reshape(
        batch, seq, out_features)

    assert y.shape == y_ref.shape
    assert jnp.allclose(y, y_ref, atol=1e-4, rtol=1e-4), \
        float(jnp.max(jnp.abs(y - y_ref)))
    print("KERNEL_OK")
</pallas_src>

<mosaic_0001>
module attributes {stable_mosaic.version = 11 : i64} {
  func.func @_mos_kernel(%arg0: i32, %arg1: i32, %arg2: i32, %arg3: memref<16x128xf32, #tpu.memory_space<vmem>>, %arg4: memref<128x128xf32, #tpu.memory_space<vmem>>, %arg5: memref<16x8xf32, #tpu.memory_space<vmem>>, %arg6: memref<128x8xf32, #tpu.memory_space<vmem>>, %arg7: memref<1x128xf32, #tpu.memory_space<vmem>>, %arg8: memref<16x128xf32, #tpu.memory_space<vmem>>, %arg9: memref<16x128xf32, #tpu.memory_space<vmem>>) attributes {dimension_semantics = [#tpu.dimension_semantics<parallel>, #tpu.dimension_semantics<parallel>, #tpu.dimension_semantics<arbitrary>], iteration_bounds = array<i64: 1, 1, 1>, scalar_prefetch = 0 : i64, scratch_operands = 1 : i64, tpu.core_type = #tpu.core_type<tc>, window_params = [{transform_indices = @transform_0, window_bounds = array<i64: 16, 128>}, {transform_indices = @transform_1, window_bounds = array<i64: 128, 128>}, {transform_indices = @transform_2, window_bounds = array<i64: 16, 8>}, {transform_indices = @transform_3, window_bounds = array<i64: 128, 8>}, {transform_indices = @transform_4, window_bounds = array<i64: 1, 128>}, {transform_indices = @transform_5, window_bounds = array<i64: 16, 128>}]} {
    %c0_i32 = arith.constant 0 : i32
    %0 = arith.cmpi eq, %arg2, %c0_i32 : i32
    %1 = arith.extui %0 : i1 to i32
    %c0_i32_0 = arith.constant 0 : i32
    %2 = arith.cmpi ne, %1, %c0_i32_0 : i32
    scf.if %2 {
      %c0_10 = arith.constant 0 : index
      %c0_11 = arith.constant 0 : index
      %12 = vector.load %arg7[%c0_10, %c0_11] : memref<1x128xf32, #tpu.memory_space<vmem>>, vector<1x128xf32>
      %13 = vector.shape_cast %12 : vector<1x128xf32> to vector<1x128xf32>
      %14 = vector.broadcast %13 : vector<1x128xf32> to vector<16x128xf32>
      %c0_12 = arith.constant 0 : index
      %c0_13 = arith.constant 0 : index
      %15 = vector.load %arg9[%c0_12, %c0_13] : memref<16x128xf32, #tpu.memory_space<vmem>>, vector<16x128xf32>
      tpu.vector_store %arg9[%c0_12, %c0_13], %14 {strides = array<i32>} : memref<16x128xf32, #tpu.memory_space<vmem>>, vector<16x128xf32>,
    } else {
    }
    %c0 = arith.constant 0 : index
    %c0_1 = arith.constant 0 : index
    %3 = vector.load %arg9[%c0, %c0_1] : memref<16x128xf32, #tpu.memory_space<vmem>>, vector<16x128xf32>
    %c0_2 = arith.constant 0 : index
    %c0_3 = arith.constant 0 : index
    %4 = vector.load %arg3[%c0_2, %c0_3] : memref<16x128xf32, #tpu.memory_space<vmem>>, vector<16x128xf32>
    %c0_4 = arith.constant 0 : index
    %c0_5 = arith.constant 0 : index
    %5 = vector.load %arg4[%c0_4, %c0_5] : memref<128x128xf32, #tpu.memory_space<vmem>>, vector<128x128xf32>
    %cst = arith.constant dense<0.000000e+00> : vector<16x128xf32>
    %6 = tpu.matmul %4, %5, %cst {dimension_numbers = #tpu.dot_dimension_numbers<[1], [1], [0], [0], [0, 0, 1, 0], [], []>} : vector<16x128xf32>, vector<128x128xf32>, vector<16x128xf32> -> vector<16x128xf32>
    %7 = arith.addf %3, %6 : vector<16x128xf32>
    %c0_6 = arith.constant 0 : index
    %c0_7 = arith.constant 0 : index
    %8 = vector.load %arg9[%c0_6, %c0_7] : memref<16x128xf32, #tpu.memory_space<vmem>>, vector<16x128xf32>
    tpu.vector_store %arg9[%c0_6, %c0_7], %7 {strides = array<i32>} : memref<16x128xf32, #tpu.memory_space<vmem>>, vector<16x128xf32>,
    %c0_i32_8 = arith.constant 0 : i32
    %9 = arith.cmpi eq, %arg2, %c0_i32_8 : i32
    %10 = arith.extui %9 : i1 to i32
    %c0_i32_9 = arith.constant 0 : i32
    %11 = arith.cmpi ne, %10, %c0_i32_9 : i32
    scf.if %11 {
      %c0_10 = arith.constant 0 : index
      %c0_11 = arith.constant 0 : index
      %12 = vector.load %arg5[%c0_10, %c0_11] : memref<16x8xf32, #tpu.memory_space<vmem>>, vector<16x8xf32>
      %c0_12 = arith.constant 0 : index
      %c0_13 = arith.constant 0 : index
      %13 = vector.load %arg6[%c0_12, %c0_13] : memref<128x8xf32, #tpu.memory_space<vmem>>, vector<128x8xf32>
      %cst_14 = arith.constant dense<0.000000e+00> : vector<16x128xf32>
      %14 = tpu.matmul %12, %13, %cst_14 {dimension_numbers = #tpu.dot_dimension_numbers<[1], [1], [0], [0], [0, 0, 1, 0], [], []>} : vector<16x8xf32>, vector<128x8xf32>, vector<16x128xf32> -> vector<16x128xf32>
      %c0_15 = arith.constant 0 : index
      %c0_16 = arith.constant 0 : index
      %15 = vector.load %arg9[%c0_15, %c0_16] : memref<16x128xf32, #tpu.memory_space<vmem>>, vector<16x128xf32>
      %16 = arith.addf %15, %14 : vector<16x128xf32>
      %c0_17 = arith.constant 0 : index
      %c0_18 = arith.constant 0 : index
      %17 = vector.load %arg8[%c0_17, %c0_18] : memref<16x128xf32, #tpu.memory_space<vmem>>, vector<16x128xf32>
      tpu.vector_store %arg8[%c0_17, %c0_18], %16 {strides = array<i32>} : memref<16x128xf32, #tpu.memory_space<vmem>>, vector<16x128xf32>,
    } else {
    }
    return
  }
  func.func @transform_0(%arg0: i32, %arg1: i32, %arg2: i32) -> (i32, i32) {
    %c0_i32 = arith.constant 0 : i32
    return %arg0, %arg2 : i32, i32
  }
  func.func @transform_1(%arg0: i32, %arg1: i32, %arg2: i32) -> (i32, i32) {
    %c0_i32 = arith.constant 0 : i32
    return %arg1, %arg2 : i32, i32
  }
  func.func @transform_2(%arg0: i32, %arg1: i32, %arg2: i32) -> (i32, i32) {
    %c0_i32 = arith.constant 0 : i32
    %c0_i32_0 = arith.constant 0 : i32
    return %arg0, %c0_i32 : i32, i32
  }
  func.func @transform_3(%arg0: i32, %arg1: i32, %arg2: i32) -> (i32, i32) {
    %c0_i32 = arith.constant 0 : i32
    %c0_i32_0 = arith.constant 0 : i32
    return %arg1, %c0_i32 : i32, i32
  }
  func.func @transform_4(%arg0: i32, %arg1: i32, %arg2: i32) -> (i32, i32) {
    %c0_i32 = arith.constant 0 : i32
    %c0_i32_0 = arith.constant 0 : i32
    return %c0_i32, %arg1 : i32, i32
  }
  func.func @transform_5(%arg0: i32, %arg1: i32, %arg2: i32) -> (i32, i32) {
    %c0_i32 = arith.constant 0 : i32
    return %arg0, %arg1 : i32, i32
  }
}

</mosaic_0001>

<bundles_post_ra>
// kernel: tpu_custom_call.1
= control target key start
LH: loop header
LB: loop body
LE: loop exit
PB: predicated region body
PF: predicated region fallthrough
CT: control target
= control target key end

     0   :  { %vm154_vm0 = vcmask 64512   ;;  %s738_s0 = inlined_call_operand.vmem [shape: f32[16,128], index: 0, kind: input, shape index: {}]   ;;  %s739_s1 = inlined_call_operand.vmem [shape: f32[128,128], index: 1, kind: input, shape index: {}]   ;;  %s740_s2 = inlined_call_operand.vmem [shape: f32[16,8], index: 2, kind: input, shape index: {}]   ;;  %s741_s3 = inlined_call_operand.vmem [shape: f32[128,8], index: 3, kind: input, shape index: {}]   ;;  %s742_s4 = inlined_call_operand.vmem [shape: f32[1,128], index: 4, kind: input, shape index: {}]   ;;  %s743_s5 = inlined_call_operand.hbm [shape: f32[16,128], index: 5, kind: output, shape index: {}]  }
   0x1   :  { %v38_v0 = vld [vmem:[%s739_s1] sm:$0xff]  ;;  %v39_v1 = vld [vmem:[%s739_s1 + $0x8] sm:$0xff]  ;;  %vm589_vm1 = vmpackc.low %vm154_vm0, %vm154_vm0 }
   0x2   :  { %v138_v2 = vld [vmem:[%s741_s3] sm:$0xff]  ;;  %v431_v3 = vpack.c.bf16 %v39_v1, %v38_v0  ;;  %v139_v4 = vld [vmem:[%s741_s3 + $0x8] sm:$0xff]  ;;  %v40_v6 = vld [vmem:[%s739_s1 + $0x10] sm:$0xff] }
   0x3   :  { %v463_v7 = vpack.c.bf16 %v139_v4, %v138_v2  ;;  %v41_v8 = vld [vmem:[%s739_s1 + $0x18] sm:$0xff]  ;;  %v140_v9 = vld [vmem:[%s741_s3 + $0x10] sm:$0xff]  ;;  %v42_v13 = vld [vmem:[%s739_s1 + $0x20] sm:$0xff] }
   0x4   :  { %v141_v10 = vld [vmem:[%s741_s3 + $0x18] sm:$0xff]  ;;  %432 = vmatprep.subr.bf16.mxu1 %v431_v3  ;;  %v435_v11 = vpack.c.bf16 %v41_v8, %v40_v6  ;;  %v43_v14 = vld [vmem:[%s739_s1 + $0x28] sm:$0xff]  ;;  %v142_v15 = vld [vmem:[%s741_s3 + $0x20] sm:$0xff] }
   0x5   :  { %v469_v12 = vpack.c.bf16 %v141_v10, %v140_v9  ;;  %434 = vmatpush3.bf16.xpose.msra.mxu1 %v431_v3  ;;  %465 = vmatprep.subr.msk.bf16.mxu0 %vm589_vm1, %v463_v7  ;;  %v143_v16 = vld [vmem:[%s741_s3 + $0x28] sm:$0xff]  ;;  %v439_v17 = vpack.c.bf16 %v43_v14, %v42_v13  ;;  %v36_v19 = vld [vmem:[%s738_s0] sm:$0xff] }
   0x6   :  { %468 = vmatpush3.bf16.xpose.msk.msra.mxu0 %vm589_vm1, %v463_v7  ;;  %436 = vmatprep.subr.bf16.mxu1 %v435_v11  ;;  %v475_v18 = vpack.c.bf16 %v143_v16, %v142_v15  ;;  %v136_v20 = vld [vmem:[%s740_s2] sm:$0xff] }
   0x7   :  { %471 = vmatprep.subr.msk.bf16.mxu0 %vm589_vm1, %v469_v12  ;;  %393 = vmatprep.mubr.f32.mxu1 %v36_v19 }
   0xd   :  { %438 = vmatpush3.bf16.xpose.msra.mxu1 %v435_v11 }
   0xe   :  { %10 = vsyncpa [#allocation4], 0  ;;  %474 = vmatpush3.bf16.xpose.msk.msra.mxu0 %vm589_vm1, %v469_v12  ;;  %440 = vmatprep.subr.bf16.mxu1 %v439_v17  ;;  %v44_v21 = vld [vmem:[%s739_s1 + $0x30] sm:$0xff]  ;;  %v45_v22 = vld [vmem:[%s739_s1 + $0x38] sm:$0xff]  ;;  %s542_s15 = smov [#allocation3]  }
   0xf   :  { %477 = vmatprep.subr.msk.bf16.mxu0 %vm589_vm1, %v475_v18  ;;  %428 = vmatprep.mubr.msk.f32.mxu0 %vm154_vm0, %v136_v20  ;;  %v144_v23 = vld [vmem:[%s741_s3 + $0x30] sm:$0xff]  ;;  %v145_v24 = vld [vmem:[%s741_s3 + $0x38] sm:$0xff]  ;;  %v443_v25 = vpack.c.bf16 %v45_v22, %v44_v21  ;;  %v46_v27 = vld [vmem:[%s739_s1 + $0x40] sm:$0xff]  ;;  %s295_s16 = sshll.u32 %s542_s15, 4  ;;  %s296_s16 = int_to_ptr.vmem [resolvable:$true] %s295_s16 }
  0x10   :  { %v481_v26 = vpack.c.bf16 %v145_v24, %v144_v23  ;;  %v47_v28 = vld [vmem:[%s739_s1 + $0x48] sm:$0xff]  ;;  %v146_v29 = vld [vmem:[%s741_s3 + $0x40] sm:$0xff]  ;;  %v48_v33 = vld [vmem:[%s739_s1 + $0x50] sm:$0xff]  ;;  %p523_p1 = scmp.lt.s32.totalorder %s296_s16, %s296_s16 }
  0x11   :  { %v147_v30 = vld [vmem:[%s741_s3 + $0x48] sm:$0xff]  ;;  %v447_v31 = vpack.c.bf16 %v47_v28, %v46_v27  ;;  %v49_v34 = vld [vmem:[%s739_s1 + $0x58] sm:$0xff]  ;;  %v148_v35 = vld [vmem:[%s741_s3 + $0x50] sm:$0xff] }
  0x12   :  { %v487_v32 = vpack.c.bf16 %v147_v30, %v146_v29  ;;  %v149_v36 = vld [vmem:[%s741_s3 + $0x58] sm:$0xff]  ;;  %v451_v37 = vpack.c.bf16 %v49_v34, %v48_v33  ;;  %v50_v39 = vld [vmem:[%s739_s1 + $0x60] sm:$0xff]  ;;  %v51_v40 = vld [vmem:[%s739_s1 + $0x68] sm:$0xff] }
  0x13   :  { %v493_v38 = vpack.c.bf16 %v149_v36, %v148_v35  ;;  %v150_v41 = vld [vmem:[%s741_s3 + $0x60] sm:$0xff]  ;;  %v151_v42 = vld [vmem:[%s741_s3 + $0x68] sm:$0xff]  ;;  %v455_v43 = vpack.c.bf16 %v51_v40, %v50_v39  ;;  %v52_v45 = vld [vmem:[%s739_s1 + $0x70] sm:$0xff] }
  0x14   :  { %v499_v44 = vpack.c.bf16 %v151_v42, %v150_v41  ;;  %v53_v46 = vld [vmem:[%s739_s1 + $0x78] sm:$0xff]  ;;  %v152_v47 = vld [vmem:[%s741_s3 + $0x70] sm:$0xff]  ;;  %v37_v51 = vld [vmem:[%s738_s0 + $0x8] sm:$0xff]  ;;  %s518_s0 = scalar_lea.vmem %s296_s16, 256 }
  0x15   :  { %442 = vmatpush3.bf16.xpose.msra.mxu1 %v439_v17  ;;  %v153_v48 = vld [vmem:[%s741_s3 + $0x78] sm:$0xff]  ;;  %v459_v49 = vpack.c.bf16 %v53_v46, %v52_v45  ;;  %v137_v52 = vld [vmem:[%s740_s2 + $0x8] sm:$0xff]  ;;  %v306_v53 = vld [vmem:[%s742_s4] ss:$0 sm:$0xff]  ;;  %p519_p0 = scmp.ne.s32.totalorder %s296_s16, %s518_s0  ;;  %p524_p2 = scmp.lt.s32.totalorder %s518_s0, %s518_s0 }
  0x16   :  { %480 = vmatpush3.bf16.xpose.msk.msra.mxu0 %vm589_vm1, %v475_v18  ;;  %444 = vmatprep.subr.bf16.mxu1 %v443_v25  ;;  %v505_v50 = vpack.c.bf16 %v153_v48, %v152_v47 }
  0x17   :  { %483 = vmatprep.subr.msk.bf16.mxu0 %vm589_vm1, %v481_v26  ;;  %p525_p3 = por %p524_p2, %p523_p1 }
  0x19   :  { %p526_p4 = pnand %p525_p3, %p519_p0 }
  0x1d   :  { %446 = vmatpush3.bf16.xpose.msra.mxu1 %v443_v25 }
  0x1e   :  { %486 = vmatpush3.bf16.xpose.msk.msra.mxu0 %vm589_vm1, %v481_v26  ;;  %448 = vmatprep.subr.bf16.mxu1 %v447_v31 }
  0x1f   :  { %489 = vmatprep.subr.msk.bf16.mxu0 %vm589_vm1, %v487_v32 }
  0x25   :  { %450 = vmatpush3.bf16.xpose.msra.mxu1 %v447_v31 }
  0x26   :  { %492 = vmatpush3.bf16.xpose.msk.msra.mxu0 %vm589_vm1, %v487_v32  ;;  %452 = vmatprep.subr.bf16.mxu1 %v451_v37 }
  0x27   :  { %495 = vmatprep.subr.msk.bf16.mxu0 %vm589_vm1, %v493_v38 }
  0x2d   :  { %454 = vmatpush3.bf16.xpose.msra.mxu1 %v451_v37 }
  0x2e   :  { %498 = vmatpush3.bf16.xpose.msk.msra.mxu0 %vm589_vm1, %v493_v38  ;;  %456 = vmatprep.subr.bf16.mxu1 %v455_v43 }
  0x2f   :  { %501 = vmatprep.subr.msk.bf16.mxu0 %vm589_vm1, %v499_v44 }
  0x35   :  { %458 = vmatpush3.bf16.xpose.msra.mxu1 %v455_v43 }
  0x36   :  { %504 = vmatpush3.bf16.xpose.msk.msra.mxu0 %vm589_vm1, %v499_v44  ;;  %460 = vmatprep.subr.bf16.mxu1 %v459_v49 }
  0x37   :  { %507 = vmatprep.subr.msk.bf16.mxu0 %vm589_vm1, %v505_v50 }
  0x3d   :  { %462 = vmatpush3.bf16.xpose.msra.mxu1 %v459_v49 }
  0x3e   :  { %510 = vmatpush3.bf16.xpose.msk.msra.mxu0 %vm589_vm1, %v505_v50 }
  0x44   :  { %394 = vmatmul.mubr.f32.vlgmr.msra.gmra.mrb[0].mxu1 %v37_v51 }
  0x45   :  { %429 = vmatmul.mubr.msk.f32.vlgmr.msra.gmra.mrb[0].mxu0 %vm154_vm0, %v137_v52 }
 0x117   :  { %v395_v54 = vpop.f32.mrb[0].mxu1 }
 0x118   :  { %v130_v55 = vadd.f32 %v395_v54, %v306_v53  ;;  %v120_v56 = vpop.f32.mrb[1].mxu1  ;;  %v430_v57 = vpop.f32.mrb[0].mxu0 }
 0x119   :  { %v129_v58 = vadd.f32 %v306_v53, %v120_v56  ;;  %v275_v59 = vpop.f32.mrb[1].mxu0 }
 0x11a   :  { %v287_v60 = vadd.f32 %v430_v57, %v130_v55 }
 0x11b   :  { %v286_v61 = vadd.f32 %v275_v59, %v129_v58 }
 0x11c   :  { %289 = vst [vmem:[#allocation3 + $0x8] sm:$0xff] %v287_v60 }
 0x11d   :  { %288 = vst [vmem:[#allocation3] sm:$0xff] %v286_v61 }
 0x11e   :  { %529 = shalt.err (!%p526_p4)
}
 0x11f   :  { %s530_s17 = scalar_lea.hbm %s743_s5, 256 }
 0x120   :  { %p531_p5 = scmp.ne.s32.totalorder %s743_s5, %s530_s17  ;;  %p534_p6 = scmp.lt.u32.totalorder %s530_s17, %s743_s5 }
 0x122   :  { %p536_p7 = pnand %p534_p6, %p531_p5 }
 0x124   :  { %539 = shalt.err (!%p536_p7)
}
 0x125   :  { %s543_s22 = smov 128   ;;  %s544_s23 = smov 8  }
 0x126   :  { %301 = dma.vmem_to_hbm [thread:$0]  %s296_s16, 256, %s743_s5, [#allocation4], %s543_s22, %s543_s22, %s544_s23  }
 0x127   :  { %540 = dma.done.wait [#allocation4], 256  }
 0x128   :  { %541 = vsyncadd [#allocation4], 4294967040 }
 0x129   :  { %305 = vsyncpa [#allocation4], 1 }

</bundles_post_ra>
